<compile_context>
chip_gen: v6e
topology: v6e:2x2x1
jax: 0.10.0
libtpu: 0.0.40
codegen_flags: <defaults>
</compile_context>

<pallas_src>
import jax
import jax.numpy as jnp
from jax.experimental import pallas as pl
from jax.experimental.pallas import tpu as pltpu

HIDDEN = 32
DEFAULT_TILE = 512  # lanes (samples) per grid step; multiple of 128.
                    # Per-step working set is ~1.5 MiB at TILE=512, far under the
                    # 16/32/32 MiB default scoped VMEM on v5e/v6e/v7x.


def state_network_kernel(t_ref, w1_ref, b1_ref, w2_ref, b2_ref, w3blk_ref, b3_ref,
                         out_ref):
    t = t_ref[...]          # [1, T]    time samples on lanes
    w1 = w1_ref[...]        # [H, 1]
    b1 = b1_ref[...]        # [H, 1]
    w2 = w2_ref[...]        # [H, H]    (out, in) orientation
    b2 = b2_ref[...]        # [H, 1]
    w3b = w3blk_ref[...]    # [2, 2H]   block-diag: [[w3, 0], [0, w3]]
    b3 = b3_ref[...]        # [2, 1]    [b3 ; 0]

    T = t.shape[1]

    # Layer 1: outer-product broadcast (contraction dim is 1, no matmul needed).
    z1 = w1 * t + b1                      # [H, T]
    a1 = jnp.tanh(z1)
    da1 = (1.0 - a1 * a1) * w1            # d a1 / dt            [H, T]

    # Layer 2 (fused value + derivative): W2 @ [a1 | da1] = [z2 | dz2]
    a1_cat = jnp.concatenate([a1, da1], axis=-1)                       # [H, 2T]
    zz = jnp.dot(w2, a1_cat, preferred_element_type=jnp.float32)       # [H, 2T]
    z2 = zz[:, :T] + b2                                                # [H, T]
    dz2 = zz[:, T:]                                                    # [H, T]
    a2 = jnp.tanh(z2)
    da2 = (1.0 - a2 * a2) * dz2

    # Layer 3 (fused): block-diagonal W3 emits [q ; dq] in one dot, bias folded in.
    a2_cat = jnp.concatenate([a2, da2], axis=0)                        # [2H, T]
    out_ref[...] = jnp.dot(w3b, a2_cat,
                           preferred_element_type=jnp.float32) + b3    # [2, T]


def state_network(t, params, tile=DEFAULT_TILE):
    """t: [N, 1] float32; params: PyTorch-oriented weights (w: [out,in], b: [out]).

    Returns [N, 2] = concat([q, dq/dt], axis=-1).

    Note: a Pallas call has ~microseconds of fixed overhead; for N below a few
    hundred the plain-XLA reference is cheaper — this kernel targets large N.
    """
    n = int(t.shape[0])
    H = params["w2"].shape[0]

    # Clamp the lane tile to the 128-rounded problem size (no oversized padding
    # for small N), keep it a multiple of 128 for unmasked lane-dense stores.
    n_round = max(128, pl.cdiv(n, 128) * 128)
    tile = max(128, min(int(tile), n_round))
    tile = (tile // 128) * 128

    # Pad N up to a multiple of the lane tile (padding lanes compute garbage that
    # is sliced away; tanh keeps everything finite).
    num_tiles = pl.cdiv(n, tile)
    n_pad = num_tiles * tile
    t_row = jnp.pad(t[:, 0].astype(jnp.float32), (0, n_pad - n)).reshape(1, n_pad)

    # Reshape weights for the transposed (samples-on-lanes) compute layout.
    w1 = params["w1"].reshape(H, 1).astype(jnp.float32)
    b1 = params["b1"].reshape(H, 1).astype(jnp.float32)
    w2 = params["w2"].astype(jnp.float32)                    # [H, H] (out, in)
    b2 = params["b2"].reshape(H, 1).astype(jnp.float32)
    w3 = params["w3"].reshape(1, H).astype(jnp.float32)
    zeros_row = jnp.zeros((1, H), jnp.float32)
    w3blk = jnp.concatenate(
        [jnp.concatenate([w3, zeros_row], axis=1),
         jnp.concatenate([zeros_row, w3], axis=1)], axis=0)  # [2, 2H]
    b3col = jnp.concatenate(
        [params["b3"].reshape(1, 1).astype(jnp.float32),
         jnp.zeros((1, 1), jnp.float32)], axis=0)            # [2, 1]

    const = lambda i: (0, 0)  # weights: resident across the whole grid
    out = pl.pallas_call(
        state_network_kernel,
        out_shape=jax.ShapeDtypeStruct((2, n_pad), jnp.float32),
        grid=(num_tiles,),
        in_specs=[
            pl.BlockSpec((1, tile), lambda i: (0, i)),   # t tile (lane-dense)
            pl.BlockSpec((H, 1), const),                 # w1
            pl.BlockSpec((H, 1), const),                 # b1
            pl.BlockSpec((H, H), const),                 # w2
            pl.BlockSpec((H, 1), const),                 # b2
            pl.BlockSpec((2, 2 * H), const),             # block-diag w3
            pl.BlockSpec((2, 1), const),                 # [b3; 0]
        ],
        out_specs=pl.BlockSpec((2, tile), lambda i: (0, i)),
        compiler_params=pltpu.CompilerParams(
            dimension_semantics=("parallel",),           # shards N across both TCs on v7x
        ),
    )(t_row, w1, b1, w2, b2, w3blk, b3col)

    return out[:, :n].T                                   # [N, 2]


def init_params(key, hidden_dim=HIDDEN):
    # nn.Linear default init: U(-1/sqrt(fan_in), 1/sqrt(fan_in)); PyTorch orientation.
    ks = jax.random.split(key, 6)

    def u(k, shape, fan_in):
        bound = 1.0 / jnp.sqrt(fan_in)
        return jax.random.uniform(k, shape, jnp.float32, -bound, bound)

    H = hidden_dim
    return {
        "w1": u(ks[0], (H, 1), 1.0),
        "b1": u(ks[1], (H,), 1.0),
        "w2": u(ks[2], (H, H), float(H)),
        "b2": u(ks[3], (H,), float(H)),
        "w3": u(ks[4], (1, H), float(H)),
        "b3": u(ks[5], (1,), float(H)),
    }


def state_network_ref(t, params):
    # Pure-JAX reference: forward + jvp w.r.t. t (same semantics as torch.autograd.grad).
    def net(tt):
        a1 = jnp.tanh(tt @ params["w1"].T + params["b1"])
        a2 = jnp.tanh(a1 @ params["w2"].T + params["b2"])
        return a2 @ params["w3"].T + params["b3"]

    q, dq = jax.jvp(net, (t,), (jnp.ones_like(t),))
    return jnp.concatenate([q, dq], axis=-1)


if __name__ == "__main__":
    key = jax.random.PRNGKey(0)
    kp, kt = jax.random.split(key)
    params = init_params(kp, HIDDEN)

    # N chosen non-multiple-of-128 to exercise padding; tile=256 -> 2-step grid.
    N = 300
    t = jax.random.uniform(kt, (N, 1), jnp.float32, 0.0, 1.0)

    out = state_network(t, params, tile=256)
    out = jax.block_until_ready(out)

    ref = state_network_ref(t, params)
    assert out.shape == (N, 2), out.shape
    # Tolerance accounts for MXU vs XLA f32 accumulation-order differences.
    assert jnp.allclose(out, ref, atol=1e-3, rtol=1e-3), (
        float(jnp.max(jnp.abs(out - ref))))

    print("KERNEL_OK")
</pallas_src>

<mosaic_0001>
module attributes {stable_mosaic.version = 11 : i64} {
  func.func @state_network_kernel(%arg0: i32, %arg1: memref<1x256xf32, #tpu.memory_space<vmem>>, %arg2: memref<32x1xf32, #tpu.memory_space<vmem>>, %arg3: memref<32x1xf32, #tpu.memory_space<vmem>>, %arg4: memref<32x32xf32, #tpu.memory_space<vmem>>, %arg5: memref<32x1xf32, #tpu.memory_space<vmem>>, %arg6: memref<2x64xf32, #tpu.memory_space<vmem>>, %arg7: memref<2x1xf32, #tpu.memory_space<vmem>>, %arg8: memref<2x256xf32, #tpu.memory_space<vmem>>) attributes {dimension_semantics = [#tpu.dimension_semantics<parallel>], iteration_bounds = array<i64: 2>, scalar_prefetch = 0 : i64, scratch_operands = 0 : i64, tpu.core_type = #tpu.core_type<tc>, window_params = [{transform_indices = @transform_0, window_bounds = array<i64: 1, 256>}, {pipeline_mode = #tpu.pipeline_mode<synchronous>, transform_indices = @transform_1, window_bounds = array<i64: 32, 1>}, {pipeline_mode = #tpu.pipeline_mode<synchronous>, transform_indices = @transform_2, window_bounds = array<i64: 32, 1>}, {pipeline_mode = #tpu.pipeline_mode<synchronous>, transform_indices = @transform_3, window_bounds = array<i64: 32, 32>}, {pipeline_mode = #tpu.pipeline_mode<synchronous>, transform_indices = @transform_4, window_bounds = array<i64: 32, 1>}, {pipeline_mode = #tpu.pipeline_mode<synchronous>, transform_indices = @transform_5, window_bounds = array<i64: 2, 64>}, {pipeline_mode = #tpu.pipeline_mode<synchronous>, transform_indices = @transform_6, window_bounds = array<i64: 2, 1>}, {transform_indices = @transform_7, window_bounds = array<i64: 2, 256>}]} {
    %c0 = arith.constant 0 : index
    %c0_0 = arith.constant 0 : index
    %0 = vector.load %arg1[%c0, %c0_0] : memref<1x256xf32, #tpu.memory_space<vmem>>, vector<1x256xf32>
    %c0_1 = arith.constant 0 : index
    %c0_2 = arith.constant 0 : index
    %1 = vector.load %arg2[%c0_1, %c0_2] : memref<32x1xf32, #tpu.memory_space<vmem>>, vector<32x1xf32>
    %c0_3 = arith.constant 0 : index
    %c0_4 = arith.constant 0 : index
    %2 = vector.load %arg3[%c0_3, %c0_4] : memref<32x1xf32, #tpu.memory_space<vmem>>, vector<32x1xf32>
    %c0_5 = arith.constant 0 : index
    %c0_6 = arith.constant 0 : index
    %3 = vector.load %arg4[%c0_5, %c0_6] : memref<32x32xf32, #tpu.memory_space<vmem>>, vector<32x32xf32>
    %c0_7 = arith.constant 0 : index
    %c0_8 = arith.constant 0 : index
    %4 = vector.load %arg5[%c0_7, %c0_8] : memref<32x1xf32, #tpu.memory_space<vmem>>, vector<32x1xf32>
    %c0_9 = arith.constant 0 : index
    %c0_10 = arith.constant 0 : index
    %5 = vector.load %arg6[%c0_9, %c0_10] : memref<2x64xf32, #tpu.memory_space<vmem>>, vector<2x64xf32>
    %c0_11 = arith.constant 0 : index
    %c0_12 = arith.constant 0 : index
    %6 = vector.load %arg7[%c0_11, %c0_12] : memref<2x1xf32, #tpu.memory_space<vmem>>, vector<2x1xf32>
    %7 = vector.broadcast %1 : vector<32x1xf32> to vector<32x256xf32>
    %8 = vector.broadcast %0 : vector<1x256xf32> to vector<32x256xf32>
    %9 = arith.mulf %7, %8 : vector<32x256xf32>
    %10 = vector.broadcast %2 : vector<32x1xf32> to vector<32x256xf32>
    %11 = arith.addf %9, %10 : vector<32x256xf32>
    %12 = math.tanh %11 : vector<32x256xf32>
    %13 = arith.mulf %12, %12 : vector<32x256xf32>
    %cst = arith.constant 1.000000e+00 : f32
    %14 = vector.broadcast %cst : f32 to vector<32x256xf32>
    %15 = arith.subf %14, %13 : vector<32x256xf32>
    %16 = vector.broadcast %1 : vector<32x1xf32> to vector<32x256xf32>
    %17 = arith.mulf %15, %16 : vector<32x256xf32>
    %18 = tpu.concatenate %12, %17 in 1 : vector<32x256xf32>, vector<32x256xf32> -> vector<32x512xf32>
    %cst_13 = arith.constant dense<0.000000e+00> : vector<32x512xf32>
    %19 = tpu.matmul %3, %18, %cst_13 {dimension_numbers = #tpu.dot_dimension_numbers<[1], [0], [0], [1], [0, 0, 1, 1], [], []>} : vector<32x32xf32>, vector<32x512xf32>, vector<32x512xf32> -> vector<32x512xf32>
    %20 = vector.extract_strided_slice %19 {offsets = [0, 0], sizes = [32, 256], strides = [1, 1]} : vector<32x512xf32> to vector<32x256xf32>
    %21 = vector.broadcast %4 : vector<32x1xf32> to vector<32x256xf32>
    %22 = arith.addf %20, %21 : vector<32x256xf32>
    %23 = vector.extract_strided_slice %19 {offsets = [0, 256], sizes = [32, 256], strides = [1, 1]} : vector<32x512xf32> to vector<32x256xf32>
    %24 = math.tanh %22 : vector<32x256xf32>
    %25 = arith.mulf %24, %24 : vector<32x256xf32>
    %cst_14 = arith.constant 1.000000e+00 : f32
    %26 = vector.broadcast %cst_14 : f32 to vector<32x256xf32>
    %27 = arith.subf %26, %25 : vector<32x256xf32>
    %28 = arith.mulf %27, %23 : vector<32x256xf32>
    %29 = tpu.concatenate %24, %28 in 0 : vector<32x256xf32>, vector<32x256xf32> -> vector<64x256xf32>
    %cst_15 = arith.constant dense<0.000000e+00> : vector<2x256xf32>
    %30 = tpu.matmul %5, %29, %cst_15 {dimension_numbers = #tpu.dot_dimension_numbers<[1], [0], [0], [1], [0, 0, 1, 1], [], []>} : vector<2x64xf32>, vector<64x256xf32>, vector<2x256xf32> -> vector<2x256xf32>
    %31 = vector.broadcast %6 : vector<2x1xf32> to vector<2x256xf32>
    %32 = arith.addf %30, %31 : vector<2x256xf32>
    %c0_16 = arith.constant 0 : index
    %c0_17 = arith.constant 0 : index
    %33 = vector.load %arg8[%c0_16, %c0_17] : memref<2x256xf32, #tpu.memory_space<vmem>>, vector<2x256xf32>
    tpu.vector_store %arg8[%c0_16, %c0_17], %32 {strides = array<i32>} : memref<2x256xf32, #tpu.memory_space<vmem>>, vector<2x256xf32>,
    return
  }
  func.func @transform_0(%arg0: i32) -> (i32, i32) {
    %c0_i32 = arith.constant 0 : i32
    %c0_i32_0 = arith.constant 0 : i32
    return %c0_i32, %arg0 : i32, i32
  }
  func.func @transform_1(%arg0: i32) -> (i32, i32) {
    %c0_i32 = arith.constant 0 : i32
    %c0_i32_0 = arith.constant 0 : i32
    %c0_i32_1 = arith.constant 0 : i32
    return %c0_i32, %c0_i32_0 : i32, i32
  }
  func.func @transform_2(%arg0: i32) -> (i32, i32) {
    %c0_i32 = arith.constant 0 : i32
    %c0_i32_0 = arith.constant 0 : i32
    %c0_i32_1 = arith.constant 0 : i32
    return %c0_i32, %c0_i32_0 : i32, i32
  }
  func.func @transform_3(%arg0: i32) -> (i32, i32) {
    %c0_i32 = arith.constant 0 : i32
    %c0_i32_0 = arith.constant 0 : i32
    %c0_i32_1 = arith.constant 0 : i32
    return %c0_i32, %c0_i32_0 : i32, i32
  }
  func.func @transform_4(%arg0: i32) -> (i32, i32) {
    %c0_i32 = arith.constant 0 : i32
    %c0_i32_0 = arith.constant 0 : i32
    %c0_i32_1 = arith.constant 0 : i32
    return %c0_i32, %c0_i32_0 : i32, i32
  }
  func.func @transform_5(%arg0: i32) -> (i32, i32) {
    %c0_i32 = arith.constant 0 : i32
    %c0_i32_0 = arith.constant 0 : i32
    %c0_i32_1 = arith.constant 0 : i32
    return %c0_i32, %c0_i32_0 : i32, i32
  }
  func.func @transform_6(%arg0: i32) -> (i32, i32) {
    %c0_i32 = arith.constant 0 : i32
    %c0_i32_0 = arith.constant 0 : i32
    %c0_i32_1 = arith.constant 0 : i32
    return %c0_i32, %c0_i32_0 : i32, i32
  }
  func.func @transform_7(%arg0: i32) -> (i32, i32) {
    %c0_i32 = arith.constant 0 : i32
    %c0_i32_0 = arith.constant 0 : i32
    return %c0_i32, %arg0 : i32, i32
  }
}

</mosaic_0001>

<bundles_post_ra>
// kernel: tpu_custom_call.1
= control target key start
LH: loop header
LB: loop body
LE: loop exit
PB: predicated region body
PF: predicated region fallthrough
CT: control target
= control target key end

     0   :  { %12 = vsyncpa [#allocation3], 0  ;;  %s1183_s0 = inlined_call_operand.vmem [shape: f32[1,512], index: 0, kind: input, shape index: {}]   ;;  %s1184_s1 = inlined_call_operand.vmem [shape: f32[32,1], index: 1, kind: input, shape index: {}]   ;;  %s1185_s2 = inlined_call_operand.vmem [shape: f32[32,1], index: 2, kind: input, shape index: {}]   ;;  %s1186_s3 = inlined_call_operand.vmem [shape: f32[32,32], index: 3, kind: input, shape index: {}]   ;;  %s1187_s4 = inlined_call_operand.vmem [shape: f32[32,1], index: 4, kind: input, shape index: {}]   ;;  %s1188_s5 = inlined_call_operand.vmem [shape: f32[2,64], index: 5, kind: input, shape index: {}]   ;;  %s1189_s6 = inlined_call_operand.vmem [shape: f32[2,1], index: 6, kind: input, shape index: {}]   ;;  %s1190_s7 = inlined_call_operand.hbm [shape: f32[2,512], index: 7, kind: output, shape index: {}]  }
   0x1   :  { %14 = vsyncpa [#allocation3 + $0x1], 0  ;;  %s1011_s24 = smov 0   ;;  %s1013_s25 = smov 0  }
   0x2   :  { %s1015_s26 = smov 0   ;;  %s1017_s27 = smov 0  }
   0x3 LB: > { %s1032_s28 = sadd.s32 4294967295, %s966_s27   ;;  %s809_s29 = sadd.s32 4294967294, %s966_s27   ;;  %s966_s27 = sphi %s1017_s27, %s1196_s27   ;;  %s962_s26 = sphi %s1015_s26, %s1195_s26   ;;  %s958_s25 = sphi %s1013_s25, %s1194_s25   ;;  %s954_s24 = sphi %s1011_s24, %s1193_s24  }
   0x4   : > { %s1036_s30 = sadd.s32 1, %s966_s27   ;;  %s179_s8 = sadd.s32 1, %s962_s26 }
   0x5   : > { %s176_s9 = ssub.s32 %s966_s27, %s1036_s30  ;;  %p189_p0 = scmp.ne.s32.totalorder %s962_s26, %s958_s25 }
   0x6   : > { %p177_p1 = scmp.eq.s32.totalorder %s176_s9, 0  ;;  %p190_p2 = scmp.eq.s32.totalorder %s1032_s28, 1 }
   0x7   : > { %p195_p3 = scmp.ne.s32.totalorder %s958_s25, %s954_s24  ;;  %p196_p4 = scmp.eq.s32.totalorder %s809_s29, 1 }
   0x8   : > { %s1047_s10 = scalar_select %p177_p1, %s962_s26, %s179_s8  }
   0x9   : > { %p1049_p5 = por %p190_p2, %p189_p0  ;;  %p1053_p6 = por %p196_p4, %p195_p3 }
   0xa   : > { %p812_p7 = scmp.ge.s32.totalorder %s966_s27, 1  ;;  %p240_p8 = scmp.lt.s32.totalorder %s966_s27, 3 }
   0xc   : > { %p241_p9 = pnand %p812_p7, %p240_p8 }
   0xd   : > { %s814_s8 = sshll.u32 (!%p241_p9), %s1032_s28, 1  ;;  %s830_s13 = sshll.u32 (!%p241_p9), %s1032_s28, 6 }
   0xe   : > { %244 = sbr.rel (%p241_p9) target bundleno = 635 (0x27b), region = 48  ;;  %p272_p10 = scmp.lt.s32.totalorder (!%p241_p9), %s814_s8, 3 }
   0xf   : > { %s751_s18 = scalar_lea.hbm (!%p241_p9), %s1190_s7, %s830_s13  ;;  %s970_s21 = smov (!%p241_p9), [#allocation2]  }
  0x10   : > { %s910_s22 = sshll.u32 (!%p241_p9), %s970_s21, 4  ;;  %s911_s22 = int_to_ptr.vmem [resolvable:$false] %s910_s22 }
  0x11   : > { %s912_s28 = scalar_lea.vmem (!%p241_p9), %s911_s22, 128 }
  0x13   : > { %v285_v0 = vld [vmem:[%s1185_s2 + $0x18] sm:$0xff]  ;;  %v968_v2 = vmov 0   ;;  %v280_v3 = vld [vmem:[%s1184_s1 + $0x10] sm:$0xff]  ;;  %v279_v4 = vld [vmem:[%s1184_s1 + $0x8] sm:$0xff]  ;;  %v969_v14 = vmov 0.0   ;;  %v317_v15 = vlaneseq  ;;  %s1198_s8 = smov (!%p272_p10, %s814_s8), 3 }
  0x14   : > { %v281_v1 = vld [vmem:[%s1184_s1 + $0x18] sm:$0xff]  ;;  %873 = vset.pattern.permute.xlu1 %v968_v2  ;;  %872 = vset.pattern.permute.xlu0 %v968_v2  ;;  %v284_v5 = vld [vmem:[%s1185_s2 + $0x10] sm:$0xff]  ;;  %v278_v6 = vld [vmem:[%s1184_s1] sm:$0xff]  ;;  %s274_s14 = scalar_lea.vmem %s1183_s0, %s1198_s8  ;;  %vm395_vm0 = vcmask 261120   ;;  %vm651_vm1 = vcmask 523264   ;;  %s268_s8 = sand.u32 1, %s958_s25  }
  0x15   : > { %352 = vperm.xlu1 %873, %v285_v0   ;;  %313 = vperm.xlu0 %872, %v281_v1   ;;  %v283_v7 = vld [vmem:[%s1185_s2 + $0x8] sm:$0xff]  ;;  %v282_v8 = vld [vmem:[%s1185_s2] sm:$0xff]  ;;  %v293_v9 = vld [vmem:[%s1187_s4 + $0x18] sm:$0xff]  ;;  %v318_v16 = vshrl.u32 %v317_v15, 7  ;;  %s813_s9 = sshll.u32 %s268_s8, 2  ;;  %s739_s19 = scalar_lea.sflag [#allocation3], %s268_s8 }
  0x16   : > { %v292_v10 = vld [vmem:[%s1187_s4 + $0x10] sm:$0xff]  ;;  %v291_v11 = vld [vmem:[%s1187_s4 + $0x8] sm:$0xff]  ;;  %v290_v12 = vld [vmem:[%s1187_s4] sm:$0xff]  ;;  %472 = vmatprep.mubr.f32.mxu0 %v969_v14  ;;  %561 = vmatprep.mubr.f32.mxu1 %v969_v14 }
  0x17   : > { %v295_v13 = vld [vmem:[%s1189_s6] sm:$0x3]  ;;  %v319_v17 = vsub.s32 0, %v318_v16  ;;  %v323_v18 = vsub.s32 1, %v318_v16 }
  0x18   : > { %v277_v19 = vld [vmem:[%s274_s14] sm:$0x3]  ;;  %s270_s14 = scalar_lea.vmem [#allocation2], %s813_s9 }
  0x19   : > { %308 = vperm.xlu0 %872, %v280_v3   ;;  %303 = vperm.xlu1 %873, %v279_v4   ;;  %v320_v20 = vrot.slane %v277_v19, %v319_v17  ;;  %v324_v21 = vrot.slane %v277_v19, %v323_v18  ;;  %v286_v4 = vld [vmem:[%s1186_s3] sm:$0xff]  ;;  %v288_v17 = vld [vmem:[%s1186_s3 + $0x10] sm:$0xff]  ;;  %v289_v18 = vld [vmem:[%s1186_s3 + $0x18] sm:$0xff]  ;;  %s753_s15 = sshll.u32 %s270_s14, 4  ;;  %s754_s15 = int_to_ptr.vmem [resolvable:$true] %s753_s15 }
  0x1a   : > { %s906_s20 = scalar_lea.vmem %s754_s15, 64  ;;  %p913_p0 = scmp.lt.s32.totalorder %s754_s15, %s911_s22 }
  0x1b   : > { %p907_p11 = scmp.ne.s32.totalorder %s754_s15, %s906_s20  ;;  %p914_p1 = scmp.lt.s32.totalorder %s912_s28, %s906_s20 }
  0x1d   : > { %347 = vperm.xlu0 %872, %v284_v5   ;;  %298 = vperm.xlu1 %873, %v278_v6   ;;  %p908_p12 = pnand %p907_p11, %p1049_p5  ;;  %p915_p2 = por %p914_p1, %p913_p0 }
  0x1f   : > { %p909_p13 = pneg %p908_p12 }
  0x21   : > { %342 = vperm.xlu0 %872, %v283_v7   ;;  %337 = vperm.xlu1 %873, %v282_v8   ;;  %p916_p3 = pnand %p915_p2, %p909_p13 }
  0x25   : > { %603 = vperm.xlu0 %872, %v293_v9   ;;  %598 = vperm.xlu1 %873, %v292_v10  }
  0x29   : > { %593 = vperm.xlu0 %872, %v291_v11   ;;  %588 = vperm.xlu1 %873, %v290_v12  }
  0x2d   : > { %648 = vperm.xlu0 %872, %v295_v13   ;;  %v287_v13 = vld [vmem:[%s1186_s3 + $0x8] sm:$0xff] }
  0x90   : > { %v353_v22 = vpop.permute.xlu1 %352  ;;  %v314_v23 = vpop.permute.xlu0 %313 }
  0x91   : > { %v333_v24 = vmul.f32 %v320_v20, %v314_v23  ;;  %v334_v25 = vmul.f32 %v324_v21, %v314_v23 }
  0x93   : > { %v361_v26 = vadd.f32 %v353_v22, %v333_v24  ;;  %v362_v27 = vadd.f32 %v353_v22, %v334_v25 }
  0x94   : > { %v309_v28 = vpop.permute.xlu0 %308  ;;  %v1104_v29 = vpop.permute.xlu1 %303 }
  0x95   : > { %874 = vtanh.f32 %v361_v26  ;;  %v331_v30 = vmul.f32 %v320_v20, %v309_v28  ;;  %v332_v31 = vmul.f32 %v324_v21, %v309_v28  ;;  %v329_v36 = vmul.f32 %v320_v20, %v1104_v29 }
  0x96   : > { %876 = vtanh.f32 %v362_v27  ;;  %v330_v37 = vmul.f32 %v324_v21, %v1104_v29 }
  0x98   : > { %v348_v32 = vpop.permute.xlu0 %347  ;;  %v1106_v33 = vpop.permute.xlu1 %298 }
  0x99   : > { %v359_v34 = vadd.f32 %v348_v32, %v331_v30  ;;  %v360_v35 = vadd.f32 %v348_v32, %v332_v31  ;;  %v327_v38 = vmul.f32 %v320_v20, %v1106_v33  ;;  %v328_v41 = vmul.f32 %v324_v21, %v1106_v33 }
  0x9b   : > { %878 = vtanh.f32 %v359_v34 }
  0x9c   : > { %880 = vtanh.f32 %v360_v35  ;;  %v343_v39 = vpop.permute.xlu0 %342  ;;  %v338_v40 = vpop.permute.xlu1 %337 }
  0x9d   : > { %v357_v42 = vadd.f32 %v343_v39, %v329_v36  ;;  %v358_v43 = vadd.f32 %v343_v39, %v330_v37  ;;  %v355_v44 = vadd.f32 %v338_v40, %v327_v38  ;;  %v356_v45 = vadd.f32 %v338_v40, %v328_v41 }
  0x9f   : > { %882 = vtanh.f32 %v357_v42 }
  0xa0   : > { %884 = vtanh.f32 %v358_v43  ;;  %v599_v19 = vpop.permute.xlu1 %598  ;;  %v604_v21 = vpop.permute.xlu0 %603 }
  0xa1   : > { %886 = vtanh.f32 %v355_v44 }
  0xa2   : > { %v875_v46 = vpop.eup %874  ;;  %888 = vtanh.f32 %v356_v45 }
  0xa3   : > { %v877_v47 = vpop.eup %876  ;;  %v377_v48 = vmul.f32 %v875_v46, %v875_v46 }
  0xa4   : > { %432 = vmatprep.subr.mxu0 %v877_v47  ;;  %v378_v49 = vmul.f32 %v877_v47, %v877_v47  ;;  %v589_v24 = vpop.permute.xlu1 %588  ;;  %v594_v27 = vpop.permute.xlu0 %593 }
  0xa5   : > { %433 = vmatpush1.msra.mxu0 %v875_v46  ;;  %v385_v50 = vsub.f32 1.0, %v377_v48 }
  0xa6   : > { %v386_v51 = vsub.f32 1.0, %v378_v49 }
  0xa7   : > { %v393_v52 = vmul.f32 %v385_v50, %v314_v23 }
  0xa8   : > { %v879_v53 = vpop.eup %878  ;;  %v394_v54 = vmul.f32 %v386_v51, %v314_v23 }
  0xa9   : > { %v881_v55 = vpop.eup %880  ;;  %v375_v56 = vmul.f32 %v879_v53, %v879_v53 }
  0xaa   : > { %434 = vmatprep.subr.mxu0 %v881_v55  ;;  %521 = vmatprep.subr.mxu1 %v394_v54  ;;  %v376_v57 = vmul.f32 %v881_v55, %v881_v55 }
  0xab   : > { %435 = vmatpush1.msra.mxu0 %v879_v53  ;;  %522 = vmatpush1.msra.mxu1 %v393_v52  ;;  %v383_v58 = vsub.f32 1.0, %v375_v56 }
  0xac   : > { %v883_v59 = vpop.eup %882  ;;  %v384_v60 = vsub.f32 1.0, %v376_v57 }
  0xad   : > { %v885_v61 = vpop.eup %884  ;;  %v391_v62 = vmul.f32 %v383_v58, %v309_v28  ;;  %v373_v63 = vmul.f32 %v883_v59, %v883_v59 }
  0xae   : > { %v887_v0 = vpop.eup %886  ;;  %436 = vmatprep.subr.mxu0 %v885_v61  ;;  %v392_v1 = vmul.f32 %v384_v60, %v309_v28  ;;  %v374_v2 = vmul.f32 %v885_v61, %v885_v61 }
  0xaf   : > { %v889_v3 = vpop.eup %888  ;;  %437 = vmatpush1.msra.mxu0 %v883_v59  ;;  %v381_v5 = vsub.f32 1.0, %v373_v63  ;;  %v371_v6 = vmul.f32 %v887_v0, %v887_v0 }
  0xb0   : > { %438 = vmatprep.subr.mxu0 %v889_v3  ;;  %523 = vmatprep.subr.mxu1 %v392_v1  ;;  %v382_v7 = vsub.f32 1.0, %v374_v2  ;;  %v372_v8 = vmul.f32 %v889_v3, %v889_v3 }
  0xb1   : > { %439 = vmatpush1.msra.mxu0 %v887_v0  ;;  %524 = vmatpush1.msra.mxu1 %v391_v62  ;;  %v389_v9 = vmul.f32 %v381_v5, %v1104_v29  ;;  %v379_v10 = vsub.f32 1.0, %v371_v6 }
  0xb2   : > { %815 = vmatmul.mubr.msk.f32.vlgmr.msra.gmra.mxu0 %vm395_vm0, %v286_v4  ;;  %v390_v11 = vmul.f32 %v382_v7, %v1104_v29  ;;  %v380_v12 = vsub.f32 1.0, %v372_v8 }
  0xb3   : > { %478 = vmatprep.mubr.f32.mxu0 %v969_v14  ;;  %v387_v16 = vmul.f32 %v379_v10, %v1106_v33 }
  0xb4   : > { %525 = vmatprep.subr.mxu1 %v390_v11  ;;  %v388_v15 = vmul.f32 %v380_v12, %v1106_v33 }
  0xb5   : > { %526 = vmatpush1.msra.mxu1 %v389_v9 }
  0xb6   : > { %816 = vmatmul.mubr.msk.f32.gmra.mxu0 %vm395_vm0, %v287_v13  ;;  %527 = vmatprep.subr.mxu1 %v388_v15  ;;  %v294_v15 = vld [vmem:[%s1188_s5] sm:$0x3] }
  0xb7   : > { %528 = vmatpush1.msra.mxu1 %v387_v16  ;;  %484 = vmatprep.mubr.f32.mxu0 %v969_v14 }
  0xb8   : > { %819 = vmatmul.mubr.msk.f32.vlgmr.msra.gmra.mxu1 %vm395_vm0, %v286_v4 }
  0xb9   : > { %567 = vmatprep.mubr.f32.mxu1 %v969_v14 }
  0xba   : > { %817 = vmatmul.mubr.msk.f32.gmra.mxu0 %vm395_vm0, %v288_v17 }
  0xbb   : > { %490 = vmatprep.mubr.f32.mxu0 %v969_v14 }
  0xbc   : > { %820 = vmatmul.mubr.msk.f32.gmra.mxu1 %vm395_vm0, %v287_v13 }
  0xbd   : > { %573 = vmatprep.mubr.f32.mxu1 %v969_v14 }
  0xbe   : > { %818 = vmatmul.mubr.msk.f32.gmra.mxu0 %vm395_vm0, %v289_v18 }
  0xbf   : > { %719 = vmatprep.mubr.f32.mxu0 %v969_v14 }
  0xc0   : > { %821 = vmatmul.mubr.msk.f32.gmra.mxu1 %vm395_vm0, %v288_v17  ;;  %v649_v17 = vpop.permute.xlu0 %648 }
  0xc1   : > { %579 = vmatprep.mubr.f32.mxu1 %v969_v14 }
  0xc4   : > { %822 = vmatmul.mubr.msk.f32.gmra.mxu1 %vm395_vm0, %v289_v18 }
 0x172   : > { %v474_v20 = vpop.f32.mrf.mxu0 }
 0x173   : > { %v606_v37 = vadd.f32 %v589_v24, %v474_v20 }
 0x174   : > { %v476_v22 = vpop.f32.mrf.mxu0 }
 0x175   : > { %v607_v28 = vadd.f32 %v589_v24, %v476_v22 }
 0x176   : > { %v480_v23 = vpop.f32.mrf.mxu0 }
 0x177   : > { %890 = vtanh.f32 %v607_v28  ;;  %v608_v34 = vadd.f32 %v594_v27, %v480_v23 }
 0x178   : > { %v482_v25 = vpop.f32.mrf.mxu0  ;;  %v1143_v26 = vpop.f32.mrf.mxu1 }
 0x179   : > { %v609_v29 = vadd.f32 %v594_v27, %v482_v25 }
 0x17a   : > { %v486_v30 = vpop.f32.mrf.mxu0  ;;  %v565_v33 = vpop.f32.mrf.mxu1 }
 0x17b   : > { %v610_v31 = vadd.f32 %v599_v19, %v486_v30  ;;  %892 = vtanh.f32 %v609_v29 }
 0x17c   : > { %v488_v32 = vpop.f32.mrf.mxu0  ;;  %v569_v39 = vpop.f32.mrf.mxu1 }
 0x17d   : > { %v611_v14 = vadd.f32 %v599_v19, %v488_v32 }
 0x17e   : > { %v492_v35 = vpop.f32.mrf.mxu0  ;;  %v571_v41 = vpop.f32.mrf.mxu1 }
 0x17f   : > { %894 = vtanh.f32 %v611_v14  ;;  %v612_v36 = vadd.f32 %v604_v21, %v492_v35 }
 0x180   : > { %896 = vtanh.f32 %v610_v31  ;;  %v494_v38 = vpop.f32.mrf.mxu0  ;;  %v575_v42 = vpop.f32.mrf.mxu1 }
 0x181   : > { %898 = vtanh.f32 %v612_v36  ;;  %v613_v40 = vadd.f32 %v604_v21, %v494_v38 }
 0x182   : > { %900 = vtanh.f32 %v608_v34  ;;  %v577_v46 = vpop.f32.mrf.mxu1 }
 0x183   : > { %902 = vtanh.f32 %v613_v40 }
 0x184   : > { %904 = vtanh.f32 %v606_v37  ;;  %v891_v43 = vpop.eup %890  ;;  %v581_v54 = vpop.f32.mrf.mxu1 }
 0x185   : > { %v623_v60 = vmul.f32 %v891_v43, %v891_v43 }
 0x186   : > { %v583_v1 = vpop.f32.mrf.mxu1 }
 0x187   : > { %v631_v6 = vsub.f32 1.0, %v623_v60 }
 0x188   : > { %v893_v44 = vpop.eup %892 }
 0x189   : > { %v625_v56 = vmul.f32 %v893_v44, %v893_v44  ;;  %v639_v12 = vmul.f32 %v631_v6, %v565_v33 }
 0x18b   : > { %v633_v2 = vsub.f32 1.0, %v625_v56 }
 0x18c   : > { %v895_v45 = vpop.eup %894 }
 0x18d   : > { %v897_v47 = vpop.eup %896  ;;  %v627_v50 = vmul.f32 %v895_v45, %v895_v45  ;;  %v641_v10 = vmul.f32 %v633_v2, %v571_v41 }
 0x18e   : > { %v899_v48 = vpop.eup %898  ;;  %v626_v53 = vmul.f32 %v897_v47, %v897_v47 }
 0x18f   : > { %v901_v49 = vpop.eup %900  ;;  %v628_v51 = vmul.f32 %v899_v48, %v899_v48  ;;  %v635_v61 = vsub.f32 1.0, %v627_v50 }
 0x190   : > { %v903_v52 = vpop.eup %902  ;;  %v624_v58 = vmul.f32 %v901_v49, %v901_v49  ;;  %v634_v0 = vsub.f32 1.0, %v626_v53 }
 0x191   : > { %v905_v55 = vpop.eup %904  ;;  %v629_v57 = vmul.f32 %v903_v52, %v903_v52  ;;  %v636_v59 = vsub.f32 1.0, %v628_v51  ;;  %v643_v7 = vmul.f32 %v635_v61, %v577_v46 }
 0x192   : > { %v622_v63 = vmul.f32 %v905_v55, %v905_v55  ;;  %v632_v4 = vsub.f32 1.0, %v624_v58  ;;  %v642_v9 = vmul.f32 %v634_v0, %v575_v42 }
 0x193   : > { %v637_v62 = vsub.f32 1.0, %v629_v57  ;;  %v644_v5 = vmul.f32 %v636_v59, %v581_v54 }
 0x194   : > { %v630_v8 = vsub.f32 1.0, %v622_v63  ;;  %v640_v11 = vmul.f32 %v632_v4, %v569_v39 }
 0x195   : > { %v645_v3 = vmul.f32 %v637_v62, %v583_v1 }
 0x196   : > { %v638_v13 = vmul.f32 %v630_v8, %v1143_v26 }
 0x197   : > { %671 = vmatprep.subr.mxu0 %v645_v3 }
 0x198   : > { %672 = vmatpush1.msra.mxu0 %v644_v5 }
 0x199   : > { %673 = vmatprep.subr.mxu0 %v643_v7 }
 0x19a   : > { %674 = vmatpush1.msra.mxu0 %v642_v9 }
 0x19b   : > { %675 = vmatprep.subr.mxu0 %v641_v10 }
 0x19c   : > { %676 = vmatpush1.msra.mxu0 %v640_v11 }
 0x19d   : > { %677 = vmatprep.subr.mxu0 %v639_v12 }
 0x19e   : > { %678 = vmatpush1.msra.mxu0 %v638_v13 }
 0x19f   : > { %679 = vmatprep.subr.mxu0 %v903_v52 }
 0x1a0   : > { %680 = vmatpush1.msra.mxu0 %v899_v48 }
 0x1a1   : > { %681 = vmatprep.subr.mxu0 %v895_v45 }
 0x1a2   : > { %682 = vmatpush1.msra.mxu0 %v897_v47 }
 0x1a3   : > { %683 = vmatprep.subr.mxu0 %v893_v44 }
 0x1a4   : > { %684 = vmatpush1.msra.mxu0 %v901_v49 }
 0x1a5   : > { %685 = vmatprep.subr.mxu0 %v891_v43 }
 0x1a6   : > { %686 = vmatpush1.msra.mxu0 %v905_v55 }
 0x1a7   : > { %823 = vmatmul.mubr.msk.f32.vlgmr.msra.gmra.mxu0 %vm651_vm1, %v294_v15 }
 0x267   : > { %v721_v16 = vpop.f32.mrf.mxu0 }
 0x268   : > { %v722_v19 = vadd.f32 %v721_v16, %v649_v17 }
 0x269   : > { %v723_v18 = vpop.f32.mrf.mxu0 }
 0x26a   : > { %v724_v20 = vadd.f32 %v723_v18, %v649_v17 }
 0x26c   : > { %v728_v21 = vcombine.low %v722_v19, %v724_v20 }
 0x26e   : > { %824 = vst.sshfl [vmem:[%s270_s14] sm:$0x33 pattern:$0x76325410] %v728_v21 }
 0x26f   : > { %919 = shalt.err (!%p916_p3)
}
 0x270   : > { %s920_s23 = scalar_lea.hbm %s751_s18, 64  ;;  %s924_s9 = scalar_lea.hbm %s1190_s7, 128 }
 0x271   : > { %p921_p4 = scmp.ne.s32.totalorder %s751_s18, %s920_s23  ;;  %p925_p9 = scmp.lt.s32.totalorder %s751_s18, %s1190_s7 }
 0x272   : > { %p926_p10 = scmp.lt.s32.totalorder %s924_s9, %s920_s23 }
 0x273   : > { %p922_p7 = pnand %p921_p4, %p1049_p5 }
 0x274   : > { %p927_p11 = por %p926_p10, %p925_p9 }
 0x275   : > { %p923_p8 = pneg %p922_p7 }
 0x277   : > { %p928_p12 = pnand %p927_p11, %p923_p8 }
 0x279   : > { %931 = shalt.err (!%p928_p12)
}
 0x27a   : > { %831 = dma.vmem_to_hbm [thread:$0]  (%p1049_p5), %s754_s15, 64, %s751_s18, %s739_s19  }
 0x27b PF: > { %p837_p13 = scmp.ge.s32.totalorder %s966_s27, 2  ;;  %s765_s16 = sand.u32 1, %s954_s24  }
 0x27c   : > { %s766_s17 = scalar_lea.sflag [#allocation3], %s765_s16 }
 0x27d   : > { %p834_p0 = pnand %p837_p13, %p1053_p6 }
 0x27f   : > { %p835_p1 = pneg %p834_p0 }
 0x281   : > { %949 = dma.done.wait (%p835_p1), %s766_s17, 64  }
 0x282   : > { %951 = vsyncadd (%p835_p1), %s766_s17, 4294967232  ;;  %p17_p2 = scmp.ge.s32.totalorder %s1036_s30, 4   ;;  %s1193_s24 = smov %s958_s25 }
 0x283   : > { %s1194_s25 = smov %s962_s26  ;;  %s1195_s26 = smov %s1047_s10 }
 0x284   : > { %s1196_s27 = smov %s1036_s30  ;;  %19 = sbr.rel (!%p17_p2) target bundleno = 3 (0x3), region = 83 }
 0x289   :  { %771 = vsyncpa [#allocation3], 1 }
 0x28a   :  { %773 = vsyncpa [#allocation3 + $0x1], 1 }

</bundles_post_ra>
